<compile_context>
chip_gen: v6e
topology: v6e:2x2x1
jax: 0.10.0
libtpu: 0.0.40
codegen_flags: <defaults>
</compile_context>

<pallas_src>
import functools

import jax
import jax.numpy as jnp
from jax.experimental import pallas as pl
from jax.experimental.pallas import tpu as pltpu

_LANE = 128


# ---------------------------------------------------------------------------
# Hardware-aware budgets
# ---------------------------------------------------------------------------
def _tpu_memory_profile():
    """Returns (vmem_capacity_bytes, multi_core_likely)."""
    try:
        info = pltpu.get_tpu_info()
        cap = int(getattr(info, "vmem_capacity_bytes", 0) or 0)
        if cap > 0:
            # 64 MiB/TC parts (v7x) carry 2 TensorCores per chip.
            return cap, cap <= (64 << 20)
    except Exception:
        pass
    return 64 << 20, False  # conservative default when the query fails


def _vmem_limit(nbytes, vmem_cap):
    """Clamp a VMEM request to ~78% of capacity (headroom for compiler scratch)."""
    cap = int(vmem_cap * 0.78)
    return int(max(min(int(nbytes), cap), min(32 << 20, cap)))


def _pick_t_tile(t, c, itemsize, max_tile_bytes):
    """Largest multiple-of-128 lane count whose (1, C, T_TILE) block fits budget."""
    max_lanes = max(_LANE, (max_tile_bytes // max(c * itemsize, 1)) // _LANE * _LANE)
    t_pad = -(-t // _LANE) * _LANE
    return min(t_pad, max_lanes)


# ---------------------------------------------------------------------------
# Kernels
# ---------------------------------------------------------------------------
def _gln_resident_kernel(x_ref, g_ref, b_ref, o_ref, *, inv_n, inv_nm1):
    """Whole (1, C, T) slab per grid step: single-pass stats + fused FMA."""
    # NOTE: C < 8 pads the sublane dim of every vreg; fine for SpexPlus C=256.
    x = x_ref[...].astype(jnp.float32)                              # (1, C, T)
    s = jnp.sum(x, axis=(1, 2), keepdims=True)                      # (1, 1, 1)
    ss = jnp.sum(x * x, axis=(1, 2), keepdims=True)
    mean = s * inv_n
    var = jnp.maximum((ss - s * mean) * inv_nm1, 0.0)               # ddof = 1
    inv_std = jax.lax.rsqrt(var)
    # Fused per-channel affine: y = x * scale + shift  (2 VPU ops / element).
    scale = g_ref[...] * inv_std                                    # (1, C, 1)
    shift = b_ref[...] - mean * scale
    o_ref[...] = (x * scale + shift).astype(o_ref.dtype)


def _gln_stats_kernel(x_ref, s_ref, ss_ref, *, t_tile, tiles_per_split, t_total,
                      need_mask):
    """Tiled phase 1: accumulate per-(batch, split) sum / sum-of-squares."""
    @pl.when(pl.program_id(2) == 0)
    def _():
        s_ref[...] = jnp.zeros_like(s_ref)
        ss_ref[...] = jnp.zeros_like(ss_ref)

    x = x_ref[...].astype(jnp.float32)                              # (1, C, Tt)
    if need_mask:
        # Ragged T (or duplicated clamped block from the core split): zero out
        # lanes past the end of the sequence before reducing.
        logical_tile = pl.program_id(1) * tiles_per_split + pl.program_id(2)
        pos = jax.lax.broadcasted_iota(jnp.int32, x.shape, 2)
        x = jnp.where(pos < (t_total - logical_tile * t_tile), x, 0.0)
    s_ref[...] += jnp.sum(x, axis=(1, 2), keepdims=True)
    ss_ref[...] += jnp.sum(x * x, axis=(1, 2), keepdims=True)


def _gln_apply_kernel(x_ref, s_ref, ss_ref, g_ref, b_ref, o_ref, *, inv_n, inv_nm1):
    """Tiled phase 2: fold partial sums -> scale/shift in-kernel, fused FMA."""
    s = jnp.sum(s_ref[...], axis=0, keepdims=True)                  # (1, 1, 1)
    ss = jnp.sum(ss_ref[...], axis=0, keepdims=True)
    mean = s * inv_n
    var = jnp.maximum((ss - s * mean) * inv_nm1, 0.0)
    inv_std = jax.lax.rsqrt(var)
    scale = g_ref[...] * inv_std                                    # (1, C, 1)
    shift = b_ref[...] - mean * scale
    o_ref[...] = (x_ref[...].astype(jnp.float32) * scale + shift).astype(o_ref.dtype)


# ---------------------------------------------------------------------------
# Wrappers
# ---------------------------------------------------------------------------
def _gln_resident(x, g, b, vmem_cap):
    n, c, t = x.shape
    n_elem = c * t
    inv_n = 1.0 / n_elem
    inv_nm1 = 1.0 / max(n_elem - 1, 1)          # Bessel (ddof=1); degenerate guard
    block_bytes = c * t * x.dtype.itemsize
    # Double-buffered in + out blocks + f32 working copy + params + headroom.
    want = 4 * block_bytes + c * t * 4 + (4 << 20)
    return pl.pallas_call(
        functools.partial(_gln_resident_kernel, inv_n=inv_n, inv_nm1=inv_nm1),
        out_shape=jax.ShapeDtypeStruct((n, c, t), x.dtype),
        grid_spec=pltpu.PrefetchScalarGridSpec(
            num_scalar_prefetch=0,
            grid=(n,),
            in_specs=[
                pl.BlockSpec((1, c, t), lambda i: (i, 0, 0)),
                pl.BlockSpec((1, c, 1), lambda i: (0, 0, 0)),
                pl.BlockSpec((1, c, 1), lambda i: (0, 0, 0)),
            ],
            out_specs=pl.BlockSpec((1, c, t), lambda i: (i, 0, 0)),
        ),
        compiler_params=pltpu.CompilerParams(
            dimension_semantics=("parallel",),
            vmem_limit_bytes=_vmem_limit(want, vmem_cap),
        ),
        cost_estimate=pl.CostEstimate(
            flops=5 * n * n_elem, transcendentals=n,
            bytes_accessed=2 * n * block_bytes),
    )(x, g, b)


def _gln_tiled(x, g, b, t_tile, vmem_cap):
    n, c, t = x.shape
    itemsize = x.dtype.itemsize
    n_elem = c * t
    inv_n = 1.0 / n_elem
    inv_nm1 = 1.0 / max(n_elem - 1, 1)
    n_t = pl.cdiv(t, t_tile)
    # Split the reduction axis across 2 "parallel" partials when N == 1 so both
    # v7x TensorCores get stats work (harmless on single-core parts).
    n_split = 2 if (n == 1 and n_t >= 2) else 1
    tps = pl.cdiv(n_t, n_split)
    need_mask = (t % t_tile != 0) or (tps * n_split != n_t)
    tile_bytes = c * t_tile * itemsize

    def x_stats_map(i, sp, j):
        # Clamp so the core-split never produces an out-of-range block index;
        # the in-kernel mask zeroes any duplicated / ragged contribution.
        return (i, 0, jnp.minimum(sp * tps + j, n_t - 1))

    # ---- Phase 1: per-(batch, split) sum / sum-of-squares over T tiles. ----
    s, ss = pl.pallas_call(
        functools.partial(_gln_stats_kernel, t_tile=t_tile, tiles_per_split=tps,
                          t_total=t, need_mask=need_mask),
        out_shape=(jax.ShapeDtypeStruct((n * n_split, 1, 1), jnp.float32),
                   jax.ShapeDtypeStruct((n * n_split, 1, 1), jnp.float32)),
        grid_spec=pltpu.PrefetchScalarGridSpec(
            num_scalar_prefetch=0,
            grid=(n, n_split, tps),
            in_specs=[pl.BlockSpec((1, c, t_tile), x_stats_map)],
            out_specs=(
                pl.BlockSpec((1, 1, 1), lambda i, sp, j: (i * n_split + sp, 0, 0)),
                pl.BlockSpec((1, 1, 1), lambda i, sp, j: (i * n_split + sp, 0, 0)),
            ),
        ),
        compiler_params=pltpu.CompilerParams(
            dimension_semantics=("parallel", "parallel", "arbitrary"),
            vmem_limit_bytes=_vmem_limit(
                2 * tile_bytes + c * t_tile * 4 + (4 << 20), vmem_cap),
        ),
        cost_estimate=pl.CostEstimate(
            flops=3 * n * n_elem, transcendentals=0,
            bytes_accessed=n * n_elem * itemsize),
    )(x)

    # ---- Phase 2: fused FMA; scale/shift derived in-kernel (no XLA glue). ----
    return pl.pallas_call(
        functools.partial(_gln_apply_kernel, inv_n=inv_n, inv_nm1=inv_nm1),
        out_shape=jax.ShapeDtypeStruct((n, c, t), x.dtype),
        grid_spec=pltpu.PrefetchScalarGridSpec(
            num_scalar_prefetch=0,
            grid=(n, n_t),
            in_specs=[
                pl.BlockSpec((1, c, t_tile), lambda i, j: (i, 0, j)),
                pl.BlockSpec((n_split, 1, 1), lambda i, j: (i, 0, 0)),
                pl.BlockSpec((n_split, 1, 1), lambda i, j: (i, 0, 0)),
                pl.BlockSpec((1, c, 1), lambda i, j: (0, 0, 0)),
                pl.BlockSpec((1, c, 1), lambda i, j: (0, 0, 0)),
            ],
            out_specs=pl.BlockSpec((1, c, t_tile), lambda i, j: (i, 0, j)),
        ),
        compiler_params=pltpu.CompilerParams(
            dimension_semantics=("parallel", "parallel"),
            vmem_limit_bytes=_vmem_limit(
                4 * tile_bytes + c * t_tile * 4 + (4 << 20), vmem_cap),
        ),
        cost_estimate=pl.CostEstimate(
            flops=2 * n * n_elem + 10 * n * c, transcendentals=n * n_t,
            bytes_accessed=2 * n * n_elem * itemsize),
    )(x, s, ss, g, b)


def global_layer_norm(x, weight, bias, *, t_tile=None):
    """GlobalLayerNorm forward. x: (N, C, T); weight: (C,)/(C,1); bias: (C,)."""
    n, c, t = x.shape
    g = weight.reshape(1, c, 1).astype(jnp.float32)
    b = bias.reshape(1, c, 1).astype(jnp.float32)
    itemsize = x.dtype.itemsize

    vmem_cap, multi_core = _tpu_memory_profile()
    max_tile_bytes = min(8 << 20, vmem_cap // 16)      # ~8 MiB @128 MiB, 4 MiB @64 MiB

    slab_bytes = c * t * itemsize
    resident_fits = (4 * slab_bytes + c * t * 4 + (4 << 20)) <= int(0.75 * vmem_cap)

    if t_tile is None:
        # Resident path is 2x HBM traffic (read+write) vs tiled 3x: prefer it
        # whenever the double-buffered slab fits comfortably in VMEM, except on
        # multi-TensorCore parts with N == 1 where the tiled path's parallel
        # T-tile axis keeps both cores busy.
        prefer_tiled = (multi_core and n == 1 and slab_bytes >= (2 << 20)
                        and t >= 2 * _LANE)
        if resident_fits and not prefer_tiled:
            return _gln_resident(x, g, b, vmem_cap)
        t_tile = _pick_t_tile(t, c, itemsize, max_tile_bytes)
    else:
        t_tile = max(_LANE, -(-int(t_tile) // _LANE) * _LANE)   # lane-align

    if pl.cdiv(t, t_tile) <= 1:
        # One tile covers all of T (short T / huge C): streaming buys nothing.
        # TODO(synk): add channel tiling for pathological C where even the
        # resident slab exceeds the VMEM budget.
        return _gln_resident(x, g, b, vmem_cap)
    return _gln_tiled(x, g, b, t_tile, vmem_cap)


def _reference(x, weight, bias):
    # Pure-JAX reference mirroring the PyTorch forward exactly.
    xf = x.astype(jnp.float32)
    mean = jnp.mean(xf, axis=(1, 2), keepdims=True)
    xc = xf - mean
    std = jnp.std(xc, axis=(1, 2), keepdims=True, ddof=1)
    xn = xc / std
    return xn * weight.reshape(1, -1, 1) + bias.reshape(1, -1, 1)


if __name__ == "__main__":
    key = jax.random.PRNGKey(0)
    k_x, k_w, k_b, k_x2, k_x3 = jax.random.split(key, 5)

    # Case 1: small shapes -> resident-slab path (block == full (C, T) extent).
    N, C, T = 2, 4, 16
    x = jax.random.normal(k_x, (N, C, T), dtype=jnp.float32)
    # nn.Linear(1, C): weight shape (C, 1) -> (C,), bias shape (C,)
    weight = jax.random.uniform(k_w, (C, 1), minval=-1.0, maxval=1.0).reshape(C)
    bias = jax.random.uniform(k_b, (C,), minval=-1.0, maxval=1.0)

    out = jax.block_until_ready(global_layer_norm(x, weight, bias))
    ref = _reference(x, weight, bias)
    assert out.shape == (N, C, T)
    assert jnp.allclose(out, ref, atol=5e-5, rtol=5e-5), "resident path mismatch"

    # Case 2: lane-dense tiled path (evenly divisible T, explicit tile).
    N2, C2, T2 = 2, 8, 512
    x2 = jax.random.normal(k_x2, (N2, C2, T2), dtype=jnp.float32)
    w2 = jax.random.uniform(k_w, (C2,), minval=-1.0, maxval=1.0)
    b2 = jax.random.uniform(k_b, (C2,), minval=-1.0, maxval=1.0)

    out2 = jax.block_until_ready(global_layer_norm(x2, w2, b2, t_tile=256))
    ref2 = _reference(x2, w2, b2)
    assert out2.shape == (N2, C2, T2)
    assert jnp.allclose(out2, ref2, atol=2e-4, rtol=2e-4), "tiled path mismatch"

    # Case 3: ragged T (not a multiple of 128) + N == 1 -> masked last tile and
    # the 2-way core-split of the stats reduction.
    N3, C3, T3 = 1, 8, 400
    x3 = jax.random.normal(k_x3, (N3, C3, T3), dtype=jnp.float32)
    w3 = jax.random.uniform(k_w, (C3,), minval=-1.0, maxval=1.0)
    b3 = jax.random.uniform(k_b, (C3,), minval=-1.0, maxval=1.0)

    out3 = jax.block_until_ready(global_layer_norm(x3, w3, b3, t_tile=128))
    ref3 = _reference(x3, w3, b3)
    assert out3.shape == (N3, C3, T3)
    assert jnp.allclose(out3, ref3, atol=2e-4, rtol=2e-4), "masked/ragged path mismatch"

    print("KERNEL_OK")
</pallas_src>

<mosaic_0001>
module attributes {stable_mosaic.version = 11 : i64} {
  func.func @_gln_resident_kernel(%arg0: i32, %arg1: memref<1x4x16xf32, #tpu.memory_space<vmem>>, %arg2: memref<1x4x1xf32, #tpu.memory_space<vmem>>, %arg3: memref<1x4x1xf32, #tpu.memory_space<vmem>>, %arg4: memref<1x4x16xf32, #tpu.memory_space<vmem>>) attributes {dimension_semantics = [#tpu.dimension_semantics<parallel>], iteration_bounds = array<i64: 2>, scalar_prefetch = 0 : i64, scratch_operands = 0 : i64, tpu.core_type = #tpu.core_type<tc>, window_params = [{transform_indices = @transform_0, window_bounds = array<i64: 1, 4, 16>}, {pipeline_mode = #tpu.pipeline_mode<synchronous>, transform_indices = @transform_1, window_bounds = array<i64: 1, 4, 1>}, {pipeline_mode = #tpu.pipeline_mode<synchronous>, transform_indices = @transform_2, window_bounds = array<i64: 1, 4, 1>}, {transform_indices = @transform_3, window_bounds = array<i64: 1, 4, 16>}]} {
    %c0 = arith.constant 0 : index
    %c0_0 = arith.constant 0 : index
    %c0_1 = arith.constant 0 : index
    %0 = vector.load %arg1[%c0, %c0_0, %c0_1] : memref<1x4x16xf32, #tpu.memory_space<vmem>>, vector<1x4x16xf32>
    %cst = arith.constant dense<0.000000e+00> : vector<1xf32>
    %1 = vector.multi_reduction <add>, %0, %cst [1, 2] : vector<1x4x16xf32> to vector<1xf32>
    %2 = vector.shape_cast %1 : vector<1xf32> to vector<1x1x1xf32>
    %3 = arith.mulf %0, %0 : vector<1x4x16xf32>
    %cst_2 = arith.constant dense<0.000000e+00> : vector<1xf32>
    %4 = vector.multi_reduction <add>, %3, %cst_2 [1, 2] : vector<1x4x16xf32> to vector<1xf32>
    %5 = vector.shape_cast %4 : vector<1xf32> to vector<1x1x1xf32>
    %cst_3 = arith.constant 1.562500e-02 : f32
    %6 = vector.broadcast %cst_3 : f32 to vector<1x1x1xf32>
    %7 = arith.mulf %2, %6 : vector<1x1x1xf32>
    %8 = arith.mulf %2, %7 : vector<1x1x1xf32>
    %9 = arith.subf %5, %8 : vector<1x1x1xf32>
    %cst_4 = arith.constant 0.0158730168 : f32
    %10 = vector.broadcast %cst_4 : f32 to vector<1x1x1xf32>
    %11 = arith.mulf %9, %10 : vector<1x1x1xf32>
    %cst_5 = arith.constant 0.000000e+00 : f32
    %12 = vector.broadcast %cst_5 : f32 to vector<1x1x1xf32>
    %13 = arith.maximumf %11, %12 : vector<1x1x1xf32>
    %14 = math.rsqrt %13 : vector<1x1x1xf32>
    %c0_6 = arith.constant 0 : index
    %c0_7 = arith.constant 0 : index
    %c0_8 = arith.constant 0 : index
    %15 = vector.load %arg2[%c0_6, %c0_7, %c0_8] : memref<1x4x1xf32, #tpu.memory_space<vmem>>, vector<1x4x1xf32>
    %16 = vector.broadcast %14 : vector<1x1x1xf32> to vector<1x4x1xf32>
    %17 = arith.mulf %15, %16 : vector<1x4x1xf32>
    %c0_9 = arith.constant 0 : index
    %c0_10 = arith.constant 0 : index
    %c0_11 = arith.constant 0 : index
    %18 = vector.load %arg3[%c0_9, %c0_10, %c0_11] : memref<1x4x1xf32, #tpu.memory_space<vmem>>, vector<1x4x1xf32>
    %19 = vector.broadcast %7 : vector<1x1x1xf32> to vector<1x4x1xf32>
    %20 = arith.mulf %19, %17 : vector<1x4x1xf32>
    %21 = arith.subf %18, %20 : vector<1x4x1xf32>
    %22 = vector.broadcast %17 : vector<1x4x1xf32> to vector<1x4x16xf32>
    %23 = arith.mulf %0, %22 : vector<1x4x16xf32>
    %24 = vector.broadcast %21 : vector<1x4x1xf32> to vector<1x4x16xf32>
    %25 = arith.addf %23, %24 : vector<1x4x16xf32>
    %c0_12 = arith.constant 0 : index
    %c0_13 = arith.constant 0 : index
    %c0_14 = arith.constant 0 : index
    %26 = vector.load %arg4[%c0_12, %c0_13, %c0_14] : memref<1x4x16xf32, #tpu.memory_space<vmem>>, vector<1x4x16xf32>
    tpu.vector_store %arg4[%c0_12, %c0_13, %c0_14], %25 {strides = array<i32>} : memref<1x4x16xf32, #tpu.memory_space<vmem>>, vector<1x4x16xf32>,
    return
  }
  func.func @transform_0(%arg0: i32) -> (i32, i32, i32) {
    %c0_i32 = arith.constant 0 : i32
    %c0_i32_0 = arith.constant 0 : i32
    %c0_i32_1 = arith.constant 0 : i32
    return %arg0, %c0_i32, %c0_i32_0 : i32, i32, i32
  }
  func.func @transform_1(%arg0: i32) -> (i32, i32, i32) {
    %c0_i32 = arith.constant 0 : i32
    %c0_i32_0 = arith.constant 0 : i32
    %c0_i32_1 = arith.constant 0 : i32
    %c0_i32_2 = arith.constant 0 : i32
    return %c0_i32, %c0_i32_0, %c0_i32_1 : i32, i32, i32
  }
  func.func @transform_2(%arg0: i32) -> (i32, i32, i32) {
    %c0_i32 = arith.constant 0 : i32
    %c0_i32_0 = arith.constant 0 : i32
    %c0_i32_1 = arith.constant 0 : i32
    %c0_i32_2 = arith.constant 0 : i32
    return %c0_i32, %c0_i32_0, %c0_i32_1 : i32, i32, i32
  }
  func.func @transform_3(%arg0: i32) -> (i32, i32, i32) {
    %c0_i32 = arith.constant 0 : i32
    %c0_i32_0 = arith.constant 0 : i32
    %c0_i32_1 = arith.constant 0 : i32
    return %arg0, %c0_i32, %c0_i32_0 : i32, i32, i32
  }
}

</mosaic_0001>

<bundles_post_ra>
// kernel: tpu_custom_call.1
= control target key start
LH: loop header
LB: loop body
LE: loop exit
PB: predicated region body
PF: predicated region fallthrough
CT: control target
= control target key end

     0   :  { %8 = vsyncpa [#allocation3], 0  ;;  %s518_s0 = inlined_call_operand.vmem [shape: f32[2,4,16], index: 0, kind: input, shape index: {}]   ;;  %s519_s1 = inlined_call_operand.vmem [shape: f32[1,4,1], index: 1, kind: input, shape index: {}]   ;;  %s520_s2 = inlined_call_operand.vmem [shape: f32[1,4,1], index: 2, kind: input, shape index: {}]   ;;  %s521_s3 = inlined_call_operand.hbm [shape: f32[2,4,16], index: 3, kind: output, shape index: {}]  }
   0x1   :  { %10 = vsyncpa [#allocation3 + $0x1], 0  ;;  %s422_s12 = smov 0   ;;  %s424_s13 = smov 0  }
   0x2   :  { %s426_s14 = smov 0   ;;  %s428_s15 = smov 0  }
   0x3 LB: > { %s443_s16 = sadd.s32 4294967295, %s398_s15   ;;  %s284_s17 = sadd.s32 4294967294, %s398_s15   ;;  %s398_s15 = sphi %s428_s15, %s527_s15   ;;  %s394_s14 = sphi %s426_s14, %s526_s14   ;;  %s390_s13 = sphi %s424_s13, %s525_s13   ;;  %s386_s12 = sphi %s422_s12, %s524_s12  }
   0x4   : > { %s447_s18 = sadd.s32 1, %s398_s15   ;;  %s91_s19 = sadd.s32 1, %s394_s14 }
   0x5   : > { %s88_s20 = ssub.s32 %s398_s15, %s447_s18  ;;  %p101_p0 = scmp.ne.s32.totalorder %s394_s14, %s390_s13 }
   0x6   : > { %p89_p1 = scmp.eq.s32.totalorder %s88_s20, 0  ;;  %p102_p2 = scmp.eq.s32.totalorder %s443_s16, 1 }
   0x7   : > { %p107_p3 = scmp.ne.s32.totalorder %s390_s13, %s386_s12  ;;  %p108_p4 = scmp.eq.s32.totalorder %s284_s17, 1 }
   0x8   : > { %s458_s21 = scalar_select %p89_p1, %s394_s14, %s91_s19  }
   0x9   : > { %p460_p5 = por %p102_p2, %p101_p0  ;;  %p464_p6 = por %p108_p4, %p107_p3 }
   0xa   : > { %p287_p7 = scmp.ge.s32.totalorder %s398_s15, 1  ;;  %p139_p8 = scmp.lt.s32.totalorder %s398_s15, 3 }
   0xc   : > { %p140_p9 = pnand %p287_p7, %p139_p8 }
   0xd   : > { %p162_p10 = scmp.lt.s32.totalorder (!%p140_p9), %s443_s16, 1  ;;  %s159_s6 = sand.u32 (!%p140_p9), 1, %s390_s13  }
   0xe   : > { %143 = sbr.rel (%p140_p9) target bundleno = 344 (0x158), region = 32  ;;  %s288_s7 = sshll.u32 (!%p140_p9), %s159_s6, 2 }
   0xf   : > { %s291_s8 = sshll.u32 (!%p140_p9), %s443_s16, 6  ;;  %s161_s9 = scalar_lea.vmem (!%p140_p9), [#allocation2], %s288_s7 }
  0x10   : > { %s225_s10 = sshll.u32 (!%p140_p9), %s161_s9, 4  ;;  %s223_s19 = scalar_lea.hbm (!%p140_p9), %s521_s3, %s291_s8  ;;  %s226_s10 = int_to_ptr.vmem [resolvable:$true] %s225_s10 }
  0x11   : > { %s212_s20 = scalar_lea.sflag (!%p140_p9), [#allocation3], %s159_s6 }
  0x13   : > { %s163_s24 = scalar_select %p162_p10, %s443_s16, 1  ;;  %vm167_vm0 = vcmask 125952   ;;  %v400_v4 = vmov 0   ;;  %v193_v24 = vld [vmem:[%s519_s1] sm:$0xf] }
  0x14   : > { %334 = vset.pattern.permute.xlu1 %v400_v4  ;;  %335 = vset.pattern.permute.xlu0 %v400_v4  ;;  %v195_v27 = vld [vmem:[%s520_s2] sm:$0xf] }
  0x15   : > { %s289_s25 = sshll.u32 %s163_s24, 2  ;;  %s338_s24 = scalar_lea.vmem %s226_s10, 64 }
  0x16   : > { %s165_s28 = scalar_lea.vmem %s518_s0, %s289_s25  ;;  %p339_p11 = scmp.ne.s32.totalorder %s226_s10, %s338_s24 }
  0x17   : > { %v166_v0 = vld [vmem:[%s165_s28] sm:$0xf]  ;;  %s401_s25 = smov [#allocation2]  }
  0x18   : > { %v168_v1 = vsel %vm167_vm0, %v166_v0, 0.0  ;;  %v177_v2 = vmul.f32 %v166_v0, %v166_v0  ;;  %p340_p12 = pnand %p339_p11, %p460_p5  ;;  %s342_s16 = sshll.u32 %s401_s25, 4  ;;  %s343_s16 = int_to_ptr.vmem [resolvable:$false] %s342_s16 }
  0x19   : > { %169 = vadd.xlane.f32.xlu0 %v168_v1  ;;  %s344_s26 = scalar_lea.vmem %s343_s16, 128  ;;  %p345_p0 = scmp.lt.s32.totalorder %s226_s10, %s343_s16 }
  0x1a   : > { %v178_v3 = vsel %vm167_vm0, %v177_v2, 0.0  ;;  %p341_p13 = pneg %p340_p12  ;;  %p346_p1 = scmp.lt.s32.totalorder %s344_s26, %s338_s24 }
  0x1c   : > { %p347_p2 = por %p346_p1, %p345_p0 }
  0x1d   : > { %179 = vadd.xlane.f32.xlu0 %v178_v3 }
  0x1e   : > { %p348_p3 = pnand %p347_p2, %p341_p13 }
  0xa2   : > { %v170_v5 = vpop.xlane.xlu0 %169 }
  0xa3   : > { %v171_v6 = vrot.slane %v170_v5, 4 }
  0xa5   : > { %v172_v7 = vadd.f32 %v171_v6, %v170_v5 }
  0xa6   : > { %v180_v8 = vpop.xlane.xlu0 %179 }
  0xa7   : > { %v173_v9 = vrot.slane %v172_v7, 2  ;;  %v181_v10 = vrot.slane %v180_v8, 4 }
  0xa9   : > { %v174_v11 = vadd.f32 %v173_v9, %v172_v7  ;;  %v182_v12 = vadd.f32 %v181_v10, %v180_v8 }
  0xab   : > { %v175_v13 = vrot.slane %v174_v11, 1  ;;  %v183_v14 = vrot.slane %v182_v12, 2 }
  0xad   : > { %v176_v15 = vadd.f32 %v175_v13, %v174_v11  ;;  %v184_v16 = vadd.f32 %v183_v14, %v182_v12 }
  0xaf   : > { %v185_v17 = vrot.slane %v184_v16, 1  ;;  %v187_v18 = vmul.f32 0.015625, %v176_v15 }
  0xb1   : > { %v186_v19 = vadd.f32 %v185_v17, %v184_v16  ;;  %v188_v20 = vmul.f32 %v187_v18, %v176_v15 }
  0xb3   : > { %v189_v21 = vsub.f32 %v186_v19, %v188_v20 }
  0xb5   : > { %v190_v22 = vmul.f32 0.015873017, %v189_v21 }
  0xb7   : > { %v191_v23 = vmax.f32 %v190_v22, 0.0 }
  0xb9   : > { %336 = vrsqrt.f32 %v191_v23 }
  0xc6   : > { %v337_v25 = vpop.eup %336 }
  0xc7   : > { %v194_v26 = vmul.f32 %v337_v25, %v193_v24 }
  0xc9   : > { %200 = vperm.xlu1 %334, %v194_v26   ;;  %v196_v28 = vmul.f32 %v194_v26, %v187_v18 }
  0xcb   : > { %v197_v29 = vsub.f32 %v195_v27, %v196_v28 }
  0xcd   : > { %206 = vperm.xlu1 %334, %v197_v29  }
 0x144   : > { %v201_v30 = vpop.permute.xlu1 %200 }
 0x145   : > { %v203_v31 = vmul.f32 %v201_v30, %v166_v0 }
 0x148   : > { %v207_v32 = vpop.permute.xlu1 %206 }
 0x149   : > { %v209_v33 = vadd.f32 %v207_v32, %v203_v31 }
 0x14b   : > { %210 = vst.msk [vmem:[%s161_s9] sm:$0xf] %vm167_vm0, %v209_v33 }
 0x14c   : > { %351 = shalt.err (!%p348_p3)
}
 0x14d   : > { %s352_s27 = scalar_lea.hbm %s223_s19, 64  ;;  %s356_s30 = scalar_lea.hbm %s521_s3, 128 }
 0x14e   : > { %p353_p4 = scmp.ne.s32.totalorder %s223_s19, %s352_s27  ;;  %p357_p9 = scmp.lt.s32.totalorder %s223_s19, %s521_s3 }
 0x14f   : > { %p358_p10 = scmp.lt.s32.totalorder %s356_s30, %s352_s27 }
 0x150   : > { %p354_p7 = pnand %p353_p4, %p460_p5 }
 0x151   : > { %p359_p11 = por %p358_p10, %p357_p9 }
 0x152   : > { %p355_p8 = pneg %p354_p7 }
 0x154   : > { %p360_p12 = pnand %p359_p11, %p355_p8 }
 0x156   : > { %363 = shalt.err (!%p360_p12)
}
 0x157   : > { %294 = dma.vmem_to_hbm [thread:$0]  (%p460_p5), %s226_s10, 64, %s223_s19, %s212_s20  }
 0x158 PF: > { %p300_p13 = scmp.ge.s32.totalorder %s398_s15, 2  ;;  %s237_s6 = sand.u32 1, %s386_s12  }
 0x159   : > { %s238_s7 = scalar_lea.sflag [#allocation3], %s237_s6 }
 0x15a   : > { %p297_p0 = pnand %p300_p13, %p464_p6 }
 0x15c   : > { %p298_p1 = pneg %p297_p0 }
 0x15e   : > { %381 = dma.done.wait (%p298_p1), %s238_s7, 64  }
 0x15f   : > { %383 = vsyncadd (%p298_p1), %s238_s7, 4294967232  ;;  %p13_p2 = scmp.ge.s32.totalorder %s447_s18, 4   ;;  %s524_s12 = smov %s390_s13 }
 0x160   : > { %s525_s13 = smov %s394_s14  ;;  %s526_s14 = smov %s458_s21 }
 0x161   : > { %s527_s15 = smov %s447_s18  ;;  %15 = sbr.rel (!%p13_p2) target bundleno = 3 (0x3), region = 67 }
 0x166   :  { %243 = vsyncpa [#allocation3], 1 }
 0x167   :  { %245 = vsyncpa [#allocation3 + $0x1], 1 }

</bundles_post_ra>
